<compile_context>
chip_gen: v7x
topology: tpu7x:2x2x1
jax: 0.10.0
libtpu: 0.0.40
codegen_flags: <defaults>
</compile_context>

<pallas_src>
import functools

import jax
import jax.numpy as jnp
from jax.experimental import pallas as pl
from jax.experimental.pallas import tpu as pltpu


def _center_loss_kernel(feats_ref, labels_ref, centers_ref, out_ref, *,
                        n_valid, inv_count, block_n):
    # feats_ref:   (block_n, D) features tile in VMEM (pipelined, edge block
    #              on the last tile may contain garbage rows -> masked below)
    # labels_ref:  (block_n, 1) int32 labels tile in VMEM (padded with 0s)
    # centers_ref: (C, D) centers, fully VMEM resident (single buffer)
    # out_ref:     (1, 1) f32 running sum / final loss in SMEM
    i = pl.program_id(0)
    last = pl.num_programs(0) - 1
    num_classes = centers_ref.shape[0]

    @pl.when(i == 0)
    def _init():
        out_ref[0, 0] = 0.0

    # ---- Exact one-hot MXU gather: centers[labels] for this tile. ----------
    lbl = labels_ref[...]                                            # (bn, 1)
    class_ids = jax.lax.broadcasted_iota(jnp.int32, (block_n, num_classes), 1)
    one_hot = (lbl == class_ids).astype(jnp.float32)                 # (bn, C)
    # 0/1 weights + HIGHEST precision -> exact row select.  Note: an
    # out-of-range label selects the zero vector instead of raising
    # (PyTorch indexing would error).
    gathered = jnp.dot(one_hot, centers_ref[...].astype(jnp.float32),
                       precision=jax.lax.Precision.HIGHEST,
                       preferred_element_type=jnp.float32)           # (bn, D)

    diff = feats_ref[...].astype(jnp.float32) - gathered
    sq = diff * diff

    rem = n_valid % block_n          # static Python int
    if rem == 0:
        # Every tile is fully valid; no masking anywhere.
        out_ref[0, 0] += jnp.sum(sq)
    else:
        @pl.when(i != last)
        def _full_tile():
            out_ref[0, 0] += jnp.sum(sq)

        @pl.when(i == last)
        def _tail_tile():
            # Rows >= rem are out-of-bounds garbage from the edge block.
            row_ids = jax.lax.broadcasted_iota(jnp.int32, sq.shape, 0)
            out_ref[0, 0] += jnp.sum(jnp.where(row_ids < rem, sq, 0.0))

    @pl.when(i == last)
    def _finalize():
        out_ref[0, 0] = out_ref[0, 0] * inv_count


def center_loss(features, labels, centers, *, block_n=512):
    """features: (N, D) float, labels: (N,) int, centers: (C, D) float -> f32 scalar.

    Matches F.mse_loss(features, centers[labels]) with 'mean' reduction.
    """
    n, d = features.shape
    c, dc = centers.shape
    assert dc == d, "feature_dim mismatch between features and centers"

    # Batch tile: multiple of 8 sublanes, clamped to the batch size
    # (a block equal to the full dim is always layout-legal).
    block_n = max(8, (int(block_n) // 8) * 8)
    if block_n >= n:
        block_n = n
    num_tiles = pl.cdiv(n, block_n)
    n_pad = num_tiles * block_n

    # Only the tiny labels array is padded; features stream unpadded and the
    # last (partial) tile is masked in-kernel.
    labels_col = labels.astype(jnp.int32).reshape(n, 1)
    if n_pad != n:
        labels_col = jnp.pad(labels_col, ((0, n_pad - n), (0, 0)))

    kernel = functools.partial(_center_loss_kernel, n_valid=n,
                               inv_count=1.0 / float(n * d), block_n=block_n)

    # VMEM budget: double-buffered feature + label tiles, resident centers,
    # plus headroom for the one-hot / diff temporaries.
    lane = 128
    d_pad = ((d + lane - 1) // lane) * lane
    c_lanes = ((c + lane - 1) // lane) * lane
    c_rows = ((c + 7) // 8) * 8
    feat_bytes = jnp.dtype(features.dtype).itemsize
    ctr_bytes = jnp.dtype(centers.dtype).itemsize
    vmem_needed = (2 * block_n * d_pad * feat_bytes        # features double-buffer
                   + 2 * block_n * lane * 4                # labels double-buffer
                   + c_rows * d_pad * ctr_bytes            # resident centers
                   + 3 * block_n * (d_pad + c_lanes) * 4   # temporaries headroom
                   + (2 << 20))                            # slack
    vmem_limit = int(min(max(vmem_needed, 32 << 20), 100 << 20))

    grid_spec = pltpu.PrefetchScalarGridSpec(
        num_scalar_prefetch=0,
        grid=(num_tiles,),
        in_specs=[
            # features: streamed (block_n, D) tiles, auto double-buffered.
            pl.BlockSpec((block_n, d), lambda i: (i, 0)),
            # labels: per-tile (block_n, 1) int32 column (keeps the one-hot
            # build fully vectorized; no scalar-loop work).
            pl.BlockSpec((block_n, 1), lambda i: (i, 0)),
            # centers: whole table resident in VMEM (single buffer).
            pl.BlockSpec(memory_space=pltpu.VMEM),
        ],
        out_specs=pl.BlockSpec(memory_space=pltpu.SMEM),   # (1, 1) scalar loss
    )

    out = pl.pallas_call(
        kernel,
        grid_spec=grid_spec,
        out_shape=jax.ShapeDtypeStruct((1, 1), jnp.float32),
        compiler_params=pltpu.CompilerParams(
            # Scalar accumulator carried across tiles -> serial grid axis.
            dimension_semantics=("arbitrary",),
            vmem_limit_bytes=vmem_limit,
        ),
    )(features, labels_col, centers)
    return out[0, 0]


class CenterLossPallas:
    """JAX/Pallas port of the PyTorch CenterLoss module (forward only)."""

    def __init__(self, num_classes, feature_dim, alpha=0.5, key=None):
        self.num_classes = num_classes
        self.feature_dim = feature_dim
        self.alpha = alpha  # unused in forward (matches the PyTorch reference)
        if key is None:
            key = jax.random.PRNGKey(42)
        # nn.Parameter(torch.randn(num_classes, feature_dim)) -> standard normal
        self.centers = jax.random.normal(
            key, (num_classes, feature_dim), dtype=jnp.float32)

    def __call__(self, features, labels, *, block_n=512):
        return center_loss(features, labels, self.centers, block_n=block_n)


if __name__ == "__main__":
    # Small deterministic example: batch=20, num_classes=10, feature_dim=128.
    N, C, D = 20, 10, 128
    key = jax.random.PRNGKey(0)
    k_feat, k_lab, k_ctr = jax.random.split(key, 3)

    features = jax.random.normal(k_feat, (N, D), dtype=jnp.float32)
    labels = jax.random.randint(k_lab, (N,), 0, C, dtype=jnp.int32)

    module = CenterLossPallas(num_classes=C, feature_dim=D, alpha=0.5, key=k_ctr)

    # Multi-tile path: block_n=8 -> 3 tiles, last one partial (masked tail).
    loss_tiled = jax.block_until_ready(module(features, labels, block_n=8))
    # Single-tile path: default block_n clamps to N (no masking).
    loss_single = jax.block_until_ready(module(features, labels))

    # Pure-JAX reference (same semantics as F.mse_loss with default 'mean').
    centers_batch = module.centers[labels]
    ref = jnp.mean((features - centers_batch) ** 2)
    assert jnp.allclose(loss_tiled, ref, rtol=1e-4, atol=1e-4), (loss_tiled, ref)
    assert jnp.allclose(loss_single, ref, rtol=1e-4, atol=1e-4), (loss_single, ref)

    print("KERNEL_OK")
</pallas_src>

<mosaic_0001>
module attributes {stable_mosaic.version = 11 : i64} {
  func.func @_center_loss_kernel(%arg0: i32, %arg1: memref<8x128xf32, #tpu.memory_space<vmem>>, %arg2: memref<8x1xi32, #tpu.memory_space<vmem>>, %arg3: memref<10x128xf32, #tpu.memory_space<vmem>>, %arg4: memref<1x1xf32, #tpu.memory_space<smem>>) attributes {dimension_semantics = [#tpu.dimension_semantics<arbitrary>], iteration_bounds = array<i64: 3>, scalar_prefetch = 0 : i64, scratch_operands = 0 : i64, tpu.core_type = #tpu.core_type<tc>, window_params = [{transform_indices = @transform_0, window_bounds = array<i64: 8, 128>}, {transform_indices = @transform_1, window_bounds = array<i64: 8, 1>}, {pipeline_mode = #tpu.pipeline_mode<synchronous>, transform_indices = @transform_2, window_bounds = array<i64: 10, 128>}, {transform_indices = @transform_3, window_bounds = array<i64: 1, 1>}]} {
    %c0_i32 = arith.constant 0 : i32
    %0 = arith.cmpi eq, %arg0, %c0_i32 : i32
    %1 = arith.extui %0 : i1 to i32
    %c0_i32_0 = arith.constant 0 : i32
    %2 = arith.cmpi ne, %1, %c0_i32_0 : i32
    scf.if %2 {
      %cst_11 = arith.constant 0.000000e+00 : f32
      %c0_12 = arith.constant 0 : index
      %c0_13 = arith.constant 0 : index
      %23 = memref.load %arg4[%c0_12, %c0_13] : memref<1x1xf32, #tpu.memory_space<smem>>
      memref.store %cst_11, %arg4[%c0_12, %c0_13] : memref<1x1xf32, #tpu.memory_space<smem>>
    } else {
    }
    %c0 = arith.constant 0 : index
    %c0_1 = arith.constant 0 : index
    %3 = vector.load %arg2[%c0, %c0_1] : memref<8x1xi32, #tpu.memory_space<vmem>>, vector<8x1xi32>
    %4 = tpu.iota {dimensions = array<i32: 1>} : vector<8x10xi32>
    %5 = vector.broadcast %3 : vector<8x1xi32> to vector<8x10xi32>
    %6 = arith.cmpi eq, %5, %4 : vector<8x10xi32>
    %7 = arith.extui %6 : vector<8x10xi1> to vector<8x10xi32>
    %8 = arith.sitofp %7 : vector<8x10xi32> to vector<8x10xf32>
    %c0_2 = arith.constant 0 : index
    %c0_3 = arith.constant 0 : index
    %9 = vector.load %arg3[%c0_2, %c0_3] : memref<10x128xf32, #tpu.memory_space<vmem>>, vector<10x128xf32>
    %cst = arith.constant dense<0.000000e+00> : vector<8x128xf32>
    %10 = tpu.matmul %8, %9, %cst {dimension_numbers = #tpu.dot_dimension_numbers<[1], [0], [0], [1], [0, 0, 1, 1], [], []>, precision = #tpu.contract_precision<fp32>} : vector<8x10xf32>, vector<10x128xf32>, vector<8x128xf32> -> vector<8x128xf32>
    %c0_4 = arith.constant 0 : index
    %c0_5 = arith.constant 0 : index
    %11 = vector.load %arg1[%c0_4, %c0_5] : memref<8x128xf32, #tpu.memory_space<vmem>>, vector<8x128xf32>
    %12 = arith.subf %11, %10 : vector<8x128xf32>
    %13 = arith.mulf %12, %12 : vector<8x128xf32>
    %c2_i32 = arith.constant 2 : i32
    %14 = arith.cmpi ne, %arg0, %c2_i32 : i32
    %15 = arith.extui %14 : i1 to i32
    %c0_i32_6 = arith.constant 0 : i32
    %16 = arith.cmpi ne, %15, %c0_i32_6 : i32
    scf.if %16 {
      %c0_11 = arith.constant 0 : index
      %c0_12 = arith.constant 0 : index
      %23 = memref.load %arg4[%c0_11, %c0_12] : memref<1x1xf32, #tpu.memory_space<smem>>
      %24 = vector.shape_cast %13 : vector<8x128xf32> to vector<1x8x128xf32>
      %cst_13 = arith.constant dense<0.000000e+00> : vector<1xf32>
      %25 = vector.multi_reduction <add>, %24, %cst_13 [1, 2] : vector<1x8x128xf32> to vector<1xf32>
      %26 = vector.shape_cast %25 : vector<1xf32> to vector<1x1x1xf32>
      %27 = vector.extract %26[0, 0, 0] : f32 from vector<1x1x1xf32>
      %28 = arith.addf %23, %27 : f32
      %c0_14 = arith.constant 0 : index
      %c0_15 = arith.constant 0 : index
      %29 = memref.load %arg4[%c0_14, %c0_15] : memref<1x1xf32, #tpu.memory_space<smem>>
      memref.store %28, %arg4[%c0_14, %c0_15] : memref<1x1xf32, #tpu.memory_space<smem>>
    } else {
    }
    %c2_i32_7 = arith.constant 2 : i32
    %17 = arith.cmpi eq, %arg0, %c2_i32_7 : i32
    %18 = arith.extui %17 : i1 to i32
    %c0_i32_8 = arith.constant 0 : i32
    %19 = arith.cmpi ne, %18, %c0_i32_8 : i32
    scf.if %19 {
      %23 = tpu.iota {dimensions = array<i32: 0>} : vector<8x128xi32>
      %c0_11 = arith.constant 0 : index
      %c0_12 = arith.constant 0 : index
      %24 = memref.load %arg4[%c0_11, %c0_12] : memref<1x1xf32, #tpu.memory_space<smem>>
      %c4_i32 = arith.constant 4 : i32
      %25 = vector.broadcast %c4_i32 : i32 to vector<8x128xi32>
      %26 = arith.cmpi slt, %23, %25 : vector<8x128xi32>
      %cst_13 = arith.constant 0.000000e+00 : f32
      %27 = vector.broadcast %cst_13 : f32 to vector<8x128xf32>
      %28 = arith.select %26, %13, %27 : vector<8x128xi1>, vector<8x128xf32>
      %29 = vector.shape_cast %28 : vector<8x128xf32> to vector<1x8x128xf32>
      %cst_14 = arith.constant dense<0.000000e+00> : vector<1xf32>
      %30 = vector.multi_reduction <add>, %29, %cst_14 [1, 2] : vector<1x8x128xf32> to vector<1xf32>
      %31 = vector.shape_cast %30 : vector<1xf32> to vector<1x1x1xf32>
      %32 = vector.extract %31[0, 0, 0] : f32 from vector<1x1x1xf32>
      %33 = arith.addf %24, %32 : f32
      %c0_15 = arith.constant 0 : index
      %c0_16 = arith.constant 0 : index
      %34 = memref.load %arg4[%c0_15, %c0_16] : memref<1x1xf32, #tpu.memory_space<smem>>
      memref.store %33, %arg4[%c0_15, %c0_16] : memref<1x1xf32, #tpu.memory_space<smem>>
    } else {
    }
    %c2_i32_9 = arith.constant 2 : i32
    %20 = arith.cmpi eq, %arg0, %c2_i32_9 : i32
    %21 = arith.extui %20 : i1 to i32
    %c0_i32_10 = arith.constant 0 : i32
    %22 = arith.cmpi ne, %21, %c0_i32_10 : i32
    scf.if %22 {
      %c0_11 = arith.constant 0 : index
      %c0_12 = arith.constant 0 : index
      %23 = memref.load %arg4[%c0_11, %c0_12] : memref<1x1xf32, #tpu.memory_space<smem>>
      %cst_13 = arith.constant 3.906250e-04 : f32
      %24 = arith.mulf %23, %cst_13 : f32
      %c0_14 = arith.constant 0 : index
      %c0_15 = arith.constant 0 : index
      %25 = memref.load %arg4[%c0_14, %c0_15] : memref<1x1xf32, #tpu.memory_space<smem>>
      memref.store %24, %arg4[%c0_14, %c0_15] : memref<1x1xf32, #tpu.memory_space<smem>>
    } else {
    }
    return
  }
  func.func @transform_0(%arg0: i32) -> (i32, i32) {
    %c0_i32 = arith.constant 0 : i32
    %c0_i32_0 = arith.constant 0 : i32
    return %arg0, %c0_i32 : i32, i32
  }
  func.func @transform_1(%arg0: i32) -> (i32, i32) {
    %c0_i32 = arith.constant 0 : i32
    %c0_i32_0 = arith.constant 0 : i32
    return %arg0, %c0_i32 : i32, i32
  }
  func.func @transform_2(%arg0: i32) -> (i32, i32) {
    %c0_i32 = arith.constant 0 : i32
    %c0_i32_0 = arith.constant 0 : i32
    %c0_i32_1 = arith.constant 0 : i32
    return %c0_i32, %c0_i32_0 : i32, i32
  }
  func.func @transform_3(%arg0: i32) -> (i32, i32) {
    %c0_i32 = arith.constant 0 : i32
    %c0_i32_0 = arith.constant 0 : i32
    %c0_i32_1 = arith.constant 0 : i32
    return %c0_i32, %c0_i32_0 : i32, i32
  }
}

</mosaic_0001>

<bundles_post_ra>
// kernel: tpu_custom_call.1
= control target key start
LH: loop header
LB: loop body
LE: loop exit
PB: predicated region body
PF: predicated region fallthrough
CT: control target
= control target key end

     0   :  { %8 = vsyncpa [#allocation3], 0  ;;  %s1114_s0 = inlined_call_operand.vmem [shape: f32[20,128], index: 0, kind: input, shape index: {}]   ;;  %s1115_s1 = inlined_call_operand.vmem [shape: s32[24,1], index: 1, kind: input, shape index: {}]   ;;  %s1116_s2 = inlined_call_operand.hbm [shape: f32[10,128], index: 2, kind: input, shape index: {}]   ;;  %s1117_s3 = inlined_call_operand.hbm [shape: f32[1,1], index: 3, kind: output, shape index: {}]  }
   0x1   :  { %9 = vsyncpa [#allocation4], 0  ;;  %s1015_s12 = smov 0  }
   0x2 LB: > { %s1021_s13 = sadd.s32 4294967295, %s984_s12   ;;  %p784_p0 = scmp.ge.s32.totalorder %s984_s12, 1  ;;  %s984_s12 = sphi %s1015_s12, %s15_s12  }
   0x3   : > { %p114_p1 = scmp.lt.s32.totalorder %s984_s12, 4  ;;  %s986_s14 = smov [#allocation2]  }
   0x4   : > { %s126_s15 = sshll.u32 %s986_s14, 4  ;;  %p1118_p3 = scmp.eq.s32.totalorder %s1021_s13, 0  ;;  %s127_s15 = int_to_ptr.vmem [resolvable:$true] %s126_s15 }
   0x5   : > { %p1025_p2 = pnand %p784_p0, %p114_p1  ;;  %s930_s20 = scalar_lea.hbm %s1116_s2, 256 }
   0x6   : > { %p931_p6 = scmp.ne.s32.totalorder %s1116_s2, %s930_s20  ;;  %p937_p10 = scmp.lt.u32.totalorder %s930_s20, %s1116_s2 }
   0x7   : > { %s1120_s16 = scalar_select %p1025_p2, 1, 0 }
   0x8   : > { %p903_p4 = pneg %p1025_p2 }
   0xa   : > { %p1034_p5 = pnand %p1118_p3, %p903_p4 }
   0xc   : > { %p932_p7 = pneg %p1034_p5 }
   0xe   : > { %p933_p8 = pnand %p932_p7, %p931_p6 }
  0x10   : > { %p934_p9 = pneg %p933_p8 }
  0x12   : > { %p939_p11 = pnand %p937_p10, %p934_p9 }
  0x14   : > { %942 = shalt.err (!%p939_p11)
}
  0x15   : > { %s943_s25 = scalar_lea.vmem %s127_s15, 256  ;;  %p951_p1 = scmp.lt.s32.totalorder %s127_s15, %s127_s15 }
  0x16   : > { %p944_p12 = scmp.ne.s32.totalorder %s127_s15, %s943_s25  ;;  %p952_p4 = scmp.lt.s32.totalorder %s943_s25, %s943_s25 }
  0x18   : > { %p946_p13 = pnand %p944_p12, %p932_p7  ;;  %p953_p3 = por %p952_p4, %p951_p1 }
  0x1a   : > { %p947_p0 = pneg %p946_p13 }
  0x1c   : > { %p954_p2 = pnand %p953_p3, %p947_p0 }
  0x1e   : > { %957 = shalt.err (!%p954_p2)
}
  0x1f   : > { %s987_s26 = smov 128   ;;  %s988_s27 = smov 8  }
  0x20   : > { %906 = dma.hbm_to_vmem [thread:$0]  (!%p1034_p5), %s1116_s2, 256, %s127_s15, [#allocation3], %s987_s26, %s987_s26, %s988_s27  }
  0x21   : > { %p1122_p6 = scmp.ne.s32.totalorder %s1120_s16, 0 }
  0x22   : > { %p1123_p8 = scmp.eq.s32.totalorder (!%p1122_p6), %s1021_s13, 0 }
  0x23   : > { %156 = sbr.rel (%p1122_p6) target bundleno = 859 (0x35b), region = 32 }
  0x2a   : > { %975 = dma.done.wait (%p1123_p8), [#allocation3], 256   ;;  %p1124_p7 = pmov %p1123_p8 }
  0x2b   : > { %p178_p2 = scmp.lt.s32.totalorder %s1021_s13, 2  ;;  %s989_s30 = smov 0.0   ;;  %v990_v0 = vmov 0   ;;  %vm207_vm0 = vcmask 1041408   ;;  %v201_v2 = vld [vmem:[#allocation2] sm:$0xff]  ;;  %v991_v7 = vmov 0.0|0.0   ;;  %v193_v21 = vlaneseq }
  0x2c   : > { %977 = vsyncadd (%p1124_p7), [#allocation3], 4294967040  ;;  %p1125_p3 = pmov %p1124_p7  ;;  %929 = vset.pattern.permute.xlu0 %v990_v0  ;;  %v202_v3 = vld [vmem:[#allocation2 + $0x8] sm:$0x3]  ;;  %v212_v5 = vand.u32 4294901760, %v201_v2  ;;  %871 = vmatprep.subr.bf16.mxu0 %v991_v7  ;;  %vm992_vm1 = vmmov 0  }
  0x2d   : > { %s1064_s4 = scalar_select %p178_p2, %s1021_s13, 2  ;;  %v209_v4 = vsel %vm207_vm0, %v202_v3, 0  ;;  %862 = vmatprep.subr.bf16.mxu1 %v991_v7  ;;  %v993_v11 = vmov 0.0   ;;  %v194_v22 = vand.u32 127, %v193_v21  ;;  %vm203_vm2 = vcmask 80896  }
  0x2e   : > { %898 = sst [smem:[#allocation5]] (%p1125_p3), %s989_s30  ;;  %v215_v6 = vand.u32 4294901760, %v209_v4  ;;  %v290_v9 = vsub.f32 %v201_v2, %v212_v5  ;;  %845 = vmatprep.mubr.msk.f32.mxu0 %vm992_vm1, %v993_v11  ;;  %824 = vmatprep.mubr.msk.f32.mxu1 %vm992_vm1, %v993_v11  ;;  %p796_p5 = scmp.eq.s32.totalorder %s1021_s13, 2 }
  0x2f   : > { %s789_s5 = sshll.u32 %s1064_s4, 3  ;;  %s677_s14 = sld [smem:[#allocation5]] (!%p796_p5) }
  0x30   : > { %s185_s8 = scalar_lea.vmem %s1115_s1, %s789_s5  ;;  %v863_v8 = vpack.c.bf16 %v215_v6, %v212_v5  ;;  %v297_v10 = vsub.f32 %v209_v4, %v215_v6  ;;  %v291_v12 = vand.u32 4294901760, %v290_v9  ;;  %s181_s11 = scalar_lea.vmem %s1114_s0, %s789_s5 }
  0x31   : > { %v192_v1 = vld [vmem:[%s185_s8] sm:$0xff] }
  0x32   : > { %196 = vperm.xlu0 %929, %v192_v1   ;;  %873 = vmatpush3.bf16.msra.mxu0 %v863_v8  ;;  %v298_v13 = vand.u32 4294901760, %v297_v10  ;;  %v292_v14 = vsub.f32 %v290_v9, %v291_v12  ;;  %v869_v20 = vpack.c.bf16 %v297_v10, %v290_v9  ;;  %v670_v33 = vld [vmem:[%s181_s11] sm:$0xff] }
  0x33   : > { %864 = vmatpush3.bf16.msra.mxu1 %v863_v8  ;;  %874 = vmatprep.subr.bf16.mxu0 %v991_v7 }
  0x34   : > { %865 = vmatprep.subr.bf16.mxu1 %v991_v7  ;;  %v299_v15 = vsub.f32 %v297_v10, %v298_v13  ;;  %v875_v16 = vpack.c.bf16 %v298_v13, %v291_v12  ;;  %v293_v17 = vand.u32 4294901760, %v292_v14 }
  0x36   : > { %v300_v18 = vand.u32 4294901760, %v299_v15 }
  0x38   : > { %v866_v19 = vpack.c.bf16 %v300_v18, %v293_v17 }
  0xb1   : > { %v197_v23 = vpop.permute.xlu0 %196 }
  0xb2   : > { %vm198_vm3 = vcmp.eq.s32.totalorder %v197_v23, %v194_v22 }
  0xb3   : > { %v792_v24 = vsel %vm198_vm3, 1.0, %v993_v11 }
  0xb4   : > { %v205_v25 = vsel %vm203_vm2, %v792_v24, 0 }
  0xb5   : > { %v279_v26 = vsub.f32 %v205_v25, %v205_v25 }
  0xb7   : > { %v280_v27 = vand.u32 4294901760, %v279_v26 }
  0xb9   : > { %846 = vmatmul.mubr.f32.vlgmr.msra.gmra.mrb[0].mxu0 %v280_v27  ;;  %v281_v28 = vsub.f32 %v279_v26, %v280_v27 }
  0xba   : > { %876 = vmatpush3.bf16.msra.mxu0 %v875_v16  ;;  %852 = vmatprep.mubr.msk.f32.mxu0 %vm992_vm1, %v993_v11 }
  0xbb   : > { %v282_v29 = vand.u32 4294901760, %v281_v28  ;;  %877 = vmatprep.subr.bf16.mxu0 %v991_v7 }
  0xbd   : > { %825 = vmatmul.mubr.f32.vlgmr.msra.gmra.mrb[0].mxu1 %v282_v29 }
  0xbe   : > { %867 = vmatpush3.bf16.msra.mxu1 %v866_v19  ;;  %831 = vmatprep.mubr.msk.f32.mxu1 %vm992_vm1, %v993_v11 }
  0xbf   : > { %868 = vmatprep.subr.bf16.mxu1 %v991_v7 }
  0xc1   : > { %853 = vmatmul.mubr.msk.f32.vlgmr.msra.gmra.mrb[0].mxu0 %vm203_vm2, %v792_v24 }
  0xc2   : > { %879 = vmatpush3.bf16.msra.mxu0 %v863_v8  ;;  %859 = vmatprep.mubr.msk.f32.mxu0 %vm992_vm1, %v993_v11 }
  0xc5   : > { %832 = vmatmul.mubr.msk.f32.vlgmr.msra.gmra.mrb[0].mxu1 %vm203_vm2, %v792_v24 }
  0xc6   : > { %870 = vmatpush3.bf16.msra.mxu1 %v869_v20  ;;  %838 = vmatprep.mubr.msk.f32.mxu1 %vm992_vm1, %v993_v11 }
  0xc9   : > { %860 = vmatmul.mubr.msk.f32.vlgmr.msra.gmra.mrb[0].mxu0 %vm203_vm2, %v792_v24 }
  0xcd   : > { %839 = vmatmul.mubr.f32.vlgmr.msra.gmra.mrb[0].mxu1 %v279_v26 }
 0x19c   : > { %v666_v30 = vpop.f32.mrb[0].mxu0 }
 0x19d   : > { %v861_v31 = vpop.f32.mrb[1].mxu0 }
 0x19f   : > { %676 = sbr.rel (%p796_p5) target bundleno = 630 (0x276), region = 44 }
 0x1a0   : > { %v441_v32 = vpop.f32.mrb[0].mxu1 }
 0x1a1   : > { %v880_v34 = vadd.f32 %v666_v30, %v441_v32  ;;  %v840_v35 = vpop.f32.mrb[1].mxu1 }
 0x1a3   : > { %v671_v36 = vsub.f32 %v670_v33, %v880_v34 }
 0x1a5   : > { %v672_v37 = vmul.f32 %v671_v36, %v671_v36 }
 0x1a7   : > { %678 = vadd.xlane.f32.xlu0 %v672_v37 }
 0x234   : > { %v679_v38 = vpop.xlane.xlu0 %678 }
 0x235   : > { %v680_v39 = vrot.slane %v679_v38, 4 }
 0x237   : > { %v681_v40 = vadd.f32 %v680_v39, %v679_v38 }
 0x239   : > { %v682_v41 = vrot.slane %v681_v40, 2 }
 0x23b   : > { %v683_v42 = vadd.f32 %v682_v41, %v681_v40 }
 0x23d   : > { %v684_v43 = vrot.slane %v683_v42, 1 }
 0x23f   : > { %v685_v44 = vadd.f32 %v684_v43, %v683_v42 }
 0x241   : > { %889 = vpush %v685_v44 }
 0x272   : > { %s890_s15 = spop %889 }
 0x273   : > { %s687_s16 = sadd.f32 %s890_s15, %s677_s14 }
 0x275   : > { %689 = sst [smem:[#allocation5]] %s687_s16 }
 0x276 PF: > { %p797_p9 = scmp.ne.s32.totalorder %s1021_s13, 2 }
 0x277   : > { %v695_v45 = vshrl.u32 (!%p797_p9), %v193_v21, 7  ;;  %s696_s17 = sld [smem:[#allocation5]] (!%p797_p9) }
 0x278   : > { %693 = sbr.rel (%p797_p9) target bundleno = 844 (0x34c), region = 48 }
 0x279   : > { %vm697_vm4 = vcmp.lt.s32.totalorder (!%p797_p9), %v695_v45, 4 }
 0x27a   : > { %v698_v46 = vsel (!%p797_p9), %vm697_vm4, %v672_v37, 0.0 }
 0x27b   : > { %699 = vadd.xlane.f32.xlu0 (!%p797_p9), %v698_v46 }
 0x308   : > { %v700_v47 = vpop.xlane.xlu0 %699 }
 0x309   : > { %v701_v48 = vrot.slane %v700_v47, 4 }
 0x30b   : > { %v702_v49 = vadd.f32 %v701_v48, %v700_v47 }
 0x30d   : > { %v703_v50 = vrot.slane %v702_v49, 2 }
 0x30f   : > { %v704_v51 = vadd.f32 %v703_v50, %v702_v49 }
 0x311   : > { %v705_v52 = vrot.slane %v704_v51, 1 }
 0x313   : > { %v706_v53 = vadd.f32 %v705_v52, %v704_v51 }
 0x315   : > { %891 = vpush %v706_v53 }
 0x346   : > { %s892_s18 = spop %891 }
 0x347   : > { %s708_s19 = sadd.f32 %s892_s18, %s696_s17 }
 0x349   : > { %s712_s20 = smul.f32 0.000390625, %s708_s19 }
 0x34b   : > { %713 = sst [smem:[#allocation5]] %s712_s20 }
 0x34c PF: > { %s958_s23 = scalar_lea.hbm %s1117_s3, 16 }
 0x34d   : > { %p959_p10 = scmp.ne.s32.totalorder %s1117_s3, %s958_s23  ;;  %p964_p13 = scmp.lt.u32.totalorder %s958_s23, %s1117_s3 }
 0x34f   : > { %p960_p11 = pnand %p959_p10, %p796_p5 }
 0x351   : > { %p961_p12 = pneg %p960_p11 }
 0x353   : > { %p966_p0 = pnand %p964_p13, %p961_p12 }
 0x355   : > { %969 = shalt.err (!%p966_p0)
}
 0x356   : > { %s994_s28 = smov [#allocation5]  }
 0x357   : > { %900 = dma.smem_to_hbm (%p796_p5), %s994_s28, 16, %s1117_s3, [#allocation4]  }
 0x358   : > { %979 = dma.done.wait (%p796_p5), [#allocation4], 16  }
 0x359   : > { %981 = vsyncadd (%p796_p5), [#allocation4], 4294967280 }
 0x35a   : > { %727 = sfence }
 0x35b PF: > { %s15_s12 = sadd.s32 1, %s984_s12  }
 0x35c   : > { %p12_p1 = scmp.ge.s32.totalorder %s15_s12, 5  }
 0x35e   :  { %14 = sbr.rel (!%p12_p1) target bundleno = 2 (0x2), region = 82 }
 0x365   :  { %733 = vsyncpa [#allocation3], 1 }
 0x366   :  { %735 = vsyncpa [#allocation3 + $0x1], 1 }
 0x367   :  { %736 = vsyncpa [#allocation4], 1 }
 0x368   :  { %738 = vsyncpa [#allocation4 + $0x1], 1 }

</bundles_post_ra>
